<compile_context>
chip_gen: v7x
topology: tpu7x:2x2x1
jax: 0.10.0
libtpu: 0.0.40
codegen_flags: <defaults>
</compile_context>

<pallas_src>
import functools

import jax
import jax.numpy as jnp
from jax.experimental import pallas as pl
from jax.experimental.pallas import tpu as pltpu

# Padded problem dimensions (all multiples of 128 on the lane axis).
K_IN = 28 * 28          # 784 logical input features
K_PAD = 896             # 7 * 128
H1 = 128                # hidden1 (already lane-dense)
H2 = 64                 # logical hidden2
H2_PAD = 128            # padded hidden2
N_OUT = 10              # logical number of classes
N_PAD = 128             # padded logits width
NEG_BIG = -1.0e30       # "minus infinity" for padded logit columns


def mlp_log_softmax_kernel(x_ref, w1_ref, b1_ref, w2_ref, b2_ref,
                           w3_ref, b3_ref, o_ref):
    # ---- Linear1 + ReLU  (bf16 MXU matmul, f32 accumulate) ----
    h1 = jnp.dot(x_ref[...], w1_ref[...], preferred_element_type=jnp.float32)
    h1 = jnp.maximum(h1 + b1_ref[...], 0.0)

    # ---- Linear2 + ReLU ----
    h2 = jnp.dot(h1.astype(jnp.bfloat16), w2_ref[...],
                 preferred_element_type=jnp.float32)
    h2 = jnp.maximum(h2 + b2_ref[...], 0.0)

    # ---- Linear3 (logits, padded to 128 lanes) ----
    logits = jnp.dot(h2.astype(jnp.bfloat16), w3_ref[...],
                     preferred_element_type=jnp.float32)
    logits = logits + b3_ref[...]          # padded cols carry bias = -1e30

    # ---- log_softmax along dim=1 (numerically stable, f32) ----
    m = jnp.max(logits, axis=-1, keepdims=True)
    z = logits - m
    lse = jnp.log(jnp.sum(jnp.exp(z), axis=-1, keepdims=True))
    o_ref[...] = (z - lse).astype(o_ref.dtype)


def _round_up(n, m):
    return ((n + m - 1) // m) * m


@functools.partial(jax.jit, static_argnames=("tm",))
def mlp_forward(x, w1, b1, w2, b2, w3, b3, *, tm=256):
    """x: (B, 784) f32.  w* stored as (in_features, out_features)."""
    B = x.shape[0]

    # ---- batch tiling ----
    tm_eff = min(tm, _round_up(B, 8))          # small-batch friendly tile
    grid_b = pl.cdiv(B, tm_eff)
    b_pad = grid_b * tm_eff

    # ---- pad + cast operands (all zero padding except b3's -inf columns) ----
    x_p = jnp.pad(x, ((0, b_pad - B), (0, K_PAD - K_IN))).astype(jnp.bfloat16)

    w1_p = jnp.pad(w1, ((0, K_PAD - K_IN), (0, 0))).astype(jnp.bfloat16)
    b1_p = b1.reshape(1, H1).astype(jnp.float32)

    w2_p = jnp.pad(w2, ((0, 0), (0, H2_PAD - H2))).astype(jnp.bfloat16)
    b2_p = jnp.pad(b2, (0, H2_PAD - H2)).reshape(1, H2_PAD).astype(jnp.float32)

    w3_p = jnp.pad(w3, ((0, H2_PAD - H2), (0, N_PAD - N_OUT))).astype(jnp.bfloat16)
    b3_p = jnp.pad(b3.astype(jnp.float32), (0, N_PAD - N_OUT),
                   constant_values=NEG_BIG).reshape(1, N_PAD)

    # ---- cost estimate (advisory) ----
    flops = 2 * b_pad * (K_PAD * H1 + H1 * H2_PAD + H2_PAD * N_PAD)
    transcendentals = b_pad * (N_PAD + 1)      # exp per lane + log per row
    bytes_accessed = (
        x_p.size * 2 + w1_p.size * 2 + w2_p.size * 2 + w3_p.size * 2
        + (b1_p.size + b2_p.size + b3_p.size) * 4
        + b_pad * N_PAD * 4
    )

    resident = lambda shape: pl.BlockSpec(shape, lambda i: (0, 0))

    out = pl.pallas_call(
        mlp_log_softmax_kernel,
        out_shape=jax.ShapeDtypeStruct((b_pad, N_PAD), jnp.float32),
        grid=(grid_b,),
        in_specs=[
            pl.BlockSpec((tm_eff, K_PAD), lambda i: (i, 0)),   # x tile
            resident((K_PAD, H1)),                             # w1 (VMEM-resident)
            resident((1, H1)),                                 # b1
            resident((H1, H2_PAD)),                            # w2
            resident((1, H2_PAD)),                             # b2
            resident((H2_PAD, N_PAD)),                         # w3
            resident((1, N_PAD)),                              # b3
        ],
        out_specs=pl.BlockSpec((tm_eff, N_PAD), lambda i: (i, 0)),
        compiler_params=pltpu.CompilerParams(
            dimension_semantics=("parallel",)),
        cost_estimate=pl.CostEstimate(
            flops=flops,
            transcendentals=transcendentals,
            bytes_accessed=bytes_accessed),
    )(x_p, w1_p, b1_p, w2_p, b2_p, w3_p, b3_p)

    # strip batch padding and padded logit columns
    return out[:B, :N_OUT]


def init_params(key):
    # Deterministic init mimicking nn.Linear's U(-1/sqrt(fan_in), 1/sqrt(fan_in))
    ks = jax.random.split(key, 6)

    def linear(kw, kb, fan_in, fan_out):
        bound = 1.0 / jnp.sqrt(fan_in)
        w = jax.random.uniform(kw, (fan_in, fan_out), jnp.float32, -bound, bound)
        b = jax.random.uniform(kb, (fan_out,), jnp.float32, -bound, bound)
        return w, b

    w1, b1 = linear(ks[0], ks[1], K_IN, H1)
    w2, b2 = linear(ks[2], ks[3], H1, H2)
    w3, b3 = linear(ks[4], ks[5], H2, N_OUT)
    return w1, b1, w2, b2, w3, b3


def mlp_reference(x, w1, b1, w2, b2, w3, b3):
    h1 = jnp.maximum(x @ w1 + b1, 0.0)
    h2 = jnp.maximum(h1 @ w2 + b2, 0.0)
    logits = h2 @ w3 + b3
    return jax.nn.log_softmax(logits, axis=-1)


if __name__ == "__main__":
    key = jax.random.PRNGKey(0)
    kx, kp = jax.random.split(key)

    B = 8
    x = jax.random.uniform(kx, (B, K_IN), jnp.float32)  # flattened MNIST-like images
    params = init_params(kp)

    out = mlp_forward(x, *params)
    jax.block_until_ready(out)

    assert out.shape == (B, N_OUT)
    # log-probs should exp-sum to 1 per row
    row_sums = jnp.exp(out).sum(axis=1)
    assert jnp.allclose(row_sums, 1.0, atol=1e-4), row_sums
    # loose check vs f32 reference (kernel uses bf16 matmul inputs)
    ref = mlp_reference(x, *params)
    assert jnp.allclose(out, ref, atol=5e-2), jnp.max(jnp.abs(out - ref))

    print("KERNEL_OK")
</pallas_src>

<mosaic_0001>
module attributes {stable_mosaic.version = 11 : i64} {
  func.func @mlp_log_softmax_kernel(%arg0: i32, %arg1: memref<8x896xbf16, #tpu.memory_space<vmem>>, %arg2: memref<896x128xbf16, #tpu.memory_space<vmem>>, %arg3: memref<1x128xf32, #tpu.memory_space<vmem>>, %arg4: memref<128x128xbf16, #tpu.memory_space<vmem>>, %arg5: memref<1x128xf32, #tpu.memory_space<vmem>>, %arg6: memref<128x128xbf16, #tpu.memory_space<vmem>>, %arg7: memref<1x128xf32, #tpu.memory_space<vmem>>, %arg8: memref<8x128xf32, #tpu.memory_space<vmem>>) attributes {dimension_semantics = [#tpu.dimension_semantics<parallel>], iteration_bounds = array<i64: 1>, scalar_prefetch = 0 : i64, scratch_operands = 0 : i64, tpu.core_type = #tpu.core_type<tc>, window_params = [{transform_indices = @transform_0, window_bounds = array<i64: 8, 896>}, {pipeline_mode = #tpu.pipeline_mode<synchronous>, transform_indices = @transform_1, window_bounds = array<i64: 896, 128>}, {pipeline_mode = #tpu.pipeline_mode<synchronous>, transform_indices = @transform_2, window_bounds = array<i64: 1, 128>}, {pipeline_mode = #tpu.pipeline_mode<synchronous>, transform_indices = @transform_3, window_bounds = array<i64: 128, 128>}, {pipeline_mode = #tpu.pipeline_mode<synchronous>, transform_indices = @transform_4, window_bounds = array<i64: 1, 128>}, {pipeline_mode = #tpu.pipeline_mode<synchronous>, transform_indices = @transform_5, window_bounds = array<i64: 128, 128>}, {pipeline_mode = #tpu.pipeline_mode<synchronous>, transform_indices = @transform_6, window_bounds = array<i64: 1, 128>}, {transform_indices = @transform_7, window_bounds = array<i64: 8, 128>}]} {
    %c0 = arith.constant 0 : index
    %c0_0 = arith.constant 0 : index
    %0 = vector.load %arg1[%c0, %c0_0] : memref<8x896xbf16, #tpu.memory_space<vmem>>, vector<8x896xbf16>
    %c0_1 = arith.constant 0 : index
    %c0_2 = arith.constant 0 : index
    %1 = vector.load %arg2[%c0_1, %c0_2] : memref<896x128xbf16, #tpu.memory_space<vmem>>, vector<896x128xbf16>
    %cst = arith.constant dense<0.000000e+00> : vector<8x128xf32>
    %2 = tpu.matmul %0, %1, %cst {dimension_numbers = #tpu.dot_dimension_numbers<[1], [0], [0], [1], [0, 0, 1, 1], [], []>} : vector<8x896xbf16>, vector<896x128xbf16>, vector<8x128xf32> -> vector<8x128xf32>
    %c0_3 = arith.constant 0 : index
    %c0_4 = arith.constant 0 : index
    %3 = vector.load %arg3[%c0_3, %c0_4] : memref<1x128xf32, #tpu.memory_space<vmem>>, vector<1x128xf32>
    %4 = vector.broadcast %3 : vector<1x128xf32> to vector<8x128xf32>
    %5 = arith.addf %2, %4 : vector<8x128xf32>
    %cst_5 = arith.constant 0.000000e+00 : f32
    %6 = vector.broadcast %cst_5 : f32 to vector<8x128xf32>
    %7 = arith.maximumf %5, %6 : vector<8x128xf32>
    %8 = arith.truncf %7 : vector<8x128xf32> to vector<8x128xbf16>
    %c0_6 = arith.constant 0 : index
    %c0_7 = arith.constant 0 : index
    %9 = vector.load %arg4[%c0_6, %c0_7] : memref<128x128xbf16, #tpu.memory_space<vmem>>, vector<128x128xbf16>
    %cst_8 = arith.constant dense<0.000000e+00> : vector<8x128xf32>
    %10 = tpu.matmul %8, %9, %cst_8 {dimension_numbers = #tpu.dot_dimension_numbers<[1], [0], [0], [1], [0, 0, 1, 1], [], []>} : vector<8x128xbf16>, vector<128x128xbf16>, vector<8x128xf32> -> vector<8x128xf32>
    %c0_9 = arith.constant 0 : index
    %c0_10 = arith.constant 0 : index
    %11 = vector.load %arg5[%c0_9, %c0_10] : memref<1x128xf32, #tpu.memory_space<vmem>>, vector<1x128xf32>
    %12 = vector.broadcast %11 : vector<1x128xf32> to vector<8x128xf32>
    %13 = arith.addf %10, %12 : vector<8x128xf32>
    %cst_11 = arith.constant 0.000000e+00 : f32
    %14 = vector.broadcast %cst_11 : f32 to vector<8x128xf32>
    %15 = arith.maximumf %13, %14 : vector<8x128xf32>
    %16 = arith.truncf %15 : vector<8x128xf32> to vector<8x128xbf16>
    %c0_12 = arith.constant 0 : index
    %c0_13 = arith.constant 0 : index
    %17 = vector.load %arg6[%c0_12, %c0_13] : memref<128x128xbf16, #tpu.memory_space<vmem>>, vector<128x128xbf16>
    %cst_14 = arith.constant dense<0.000000e+00> : vector<8x128xf32>
    %18 = tpu.matmul %16, %17, %cst_14 {dimension_numbers = #tpu.dot_dimension_numbers<[1], [0], [0], [1], [0, 0, 1, 1], [], []>} : vector<8x128xbf16>, vector<128x128xbf16>, vector<8x128xf32> -> vector<8x128xf32>
    %c0_15 = arith.constant 0 : index
    %c0_16 = arith.constant 0 : index
    %19 = vector.load %arg7[%c0_15, %c0_16] : memref<1x128xf32, #tpu.memory_space<vmem>>, vector<1x128xf32>
    %20 = vector.broadcast %19 : vector<1x128xf32> to vector<8x128xf32>
    %21 = arith.addf %18, %20 : vector<8x128xf32>
    %cst_17 = arith.constant dense<0xFF800000> : vector<8xf32>
    %22 = vector.multi_reduction <maximumf>, %21, %cst_17 [1] : vector<8x128xf32> to vector<8xf32>
    %23 = vector.shape_cast %22 : vector<8xf32> to vector<8x1xf32>
    %24 = vector.broadcast %23 : vector<8x1xf32> to vector<8x128xf32>
    %25 = arith.subf %21, %24 : vector<8x128xf32>
    %26 = math.exp %25 : vector<8x128xf32>
    %cst_18 = arith.constant dense<0.000000e+00> : vector<8xf32>
    %27 = vector.multi_reduction <add>, %26, %cst_18 [1] : vector<8x128xf32> to vector<8xf32>
    %28 = vector.shape_cast %27 : vector<8xf32> to vector<8x1xf32>
    %29 = math.log %28 : vector<8x1xf32>
    %30 = vector.broadcast %29 : vector<8x1xf32> to vector<8x128xf32>
    %31 = arith.subf %25, %30 : vector<8x128xf32>
    %c0_19 = arith.constant 0 : index
    %c0_20 = arith.constant 0 : index
    %32 = vector.load %arg8[%c0_19, %c0_20] : memref<8x128xf32, #tpu.memory_space<vmem>>, vector<8x128xf32>
    tpu.vector_store %arg8[%c0_19, %c0_20], %31 {strides = array<i32>} : memref<8x128xf32, #tpu.memory_space<vmem>>, vector<8x128xf32>,
    return
  }
  func.func @transform_0(%arg0: i32) -> (i32, i32) {
    %c0_i32 = arith.constant 0 : i32
    %c0_i32_0 = arith.constant 0 : i32
    return %arg0, %c0_i32 : i32, i32
  }
  func.func @transform_1(%arg0: i32) -> (i32, i32) {
    %c0_i32 = arith.constant 0 : i32
    %c0_i32_0 = arith.constant 0 : i32
    %c0_i32_1 = arith.constant 0 : i32
    return %c0_i32, %c0_i32_0 : i32, i32
  }
  func.func @transform_2(%arg0: i32) -> (i32, i32) {
    %c0_i32 = arith.constant 0 : i32
    %c0_i32_0 = arith.constant 0 : i32
    %c0_i32_1 = arith.constant 0 : i32
    return %c0_i32, %c0_i32_0 : i32, i32
  }
  func.func @transform_3(%arg0: i32) -> (i32, i32) {
    %c0_i32 = arith.constant 0 : i32
    %c0_i32_0 = arith.constant 0 : i32
    %c0_i32_1 = arith.constant 0 : i32
    return %c0_i32, %c0_i32_0 : i32, i32
  }
  func.func @transform_4(%arg0: i32) -> (i32, i32) {
    %c0_i32 = arith.constant 0 : i32
    %c0_i32_0 = arith.constant 0 : i32
    %c0_i32_1 = arith.constant 0 : i32
    return %c0_i32, %c0_i32_0 : i32, i32
  }
  func.func @transform_5(%arg0: i32) -> (i32, i32) {
    %c0_i32 = arith.constant 0 : i32
    %c0_i32_0 = arith.constant 0 : i32
    %c0_i32_1 = arith.constant 0 : i32
    return %c0_i32, %c0_i32_0 : i32, i32
  }
  func.func @transform_6(%arg0: i32) -> (i32, i32) {
    %c0_i32 = arith.constant 0 : i32
    %c0_i32_0 = arith.constant 0 : i32
    %c0_i32_1 = arith.constant 0 : i32
    return %c0_i32, %c0_i32_0 : i32, i32
  }
  func.func @transform_7(%arg0: i32) -> (i32, i32) {
    %c0_i32 = arith.constant 0 : i32
    %c0_i32_0 = arith.constant 0 : i32
    return %arg0, %c0_i32 : i32, i32
  }
}

</mosaic_0001>

<bundles_post_ra>
// kernel: mlp_forward.1
= control target key start
LH: loop header
LB: loop body
LE: loop exit
PB: predicated region body
PF: predicated region fallthrough
CT: control target
= control target key end

     0   :  { %v1268_v42 = vmov 0.0   ;;  %vm1269_vm0 = vmmov 0   ;;  %s1590_s0 = inlined_call_operand.vmem [shape: bf16[8,896], index: 0, kind: input, shape index: {}]   ;;  %s1591_s1 = inlined_call_operand.vmem [shape: bf16[896,128], index: 1, kind: input, shape index: {}]   ;;  %s1592_s2 = inlined_call_operand.vmem [shape: f32[1,128], index: 2, kind: input, shape index: {}]   ;;  %s1593_s3 = inlined_call_operand.vmem [shape: bf16[128,128], index: 3, kind: input, shape index: {}]   ;;  %s1594_s4 = inlined_call_operand.vmem [shape: f32[1,128], index: 4, kind: input, shape index: {}]   ;;  %s1595_s5 = inlined_call_operand.vmem [shape: bf16[128,128], index: 5, kind: input, shape index: {}]   ;;  %s1596_s6 = inlined_call_operand.vmem [shape: f32[1,128], index: 6, kind: input, shape index: {}]   ;;  %s1597_s7 = inlined_call_operand.hbm [shape: f32[8,128], index: 7, kind: output, shape index: {}]  }
   0x1   :  { %v1161_v0 = vld [vmem:[%s1591_s1 + $0x40] sm:$0xff]   ;;  %v1165_v4 = vld [vmem:[%s1591_s1 + $0x48] sm:$0xff]   ;;  %v1169_v8 = vld [vmem:[%s1591_s1 + $0x50] sm:$0xff]  }
   0x2   :  { %v1162_v1 = vld [vmem:[%s1591_s1] sm:$0xff]   ;;  %1005 = vmatprep.subr.bf16.mxu0 %v1161_v0  ;;  %v1166_v5 = vld [vmem:[%s1591_s1 + $0x8] sm:$0xff]   ;;  %v1170_v9 = vld [vmem:[%s1591_s1 + $0x10] sm:$0xff]  }
   0x3   :  { %v1163_v2 = vld [vmem:[%s1591_s1 + $0xc0] sm:$0xff]   ;;  %1006 = vmatpush3.bf16.msra.mxu0 %v1162_v1  ;;  %v1167_v6 = vld [vmem:[%s1591_s1 + $0xc8] sm:$0xff]   ;;  %v1171_v10 = vld [vmem:[%s1591_s1 + $0xd0] sm:$0xff]  }
   0x4   :  { %v1164_v3 = vld [vmem:[%s1591_s1 + $0x80] sm:$0xff]   ;;  %1027 = vmatprep.subr.bf16.mxu1 %v1163_v2  ;;  %1007 = vmatprep.subr.bf16.mxu0 %v1165_v4  ;;  %v1168_v7 = vld [vmem:[%s1591_s1 + $0x88] sm:$0xff]   ;;  %v1172_v11 = vld [vmem:[%s1591_s1 + $0x90] sm:$0xff]  }
   0x5   :  { %1028 = vmatpush3.bf16.msra.mxu1 %v1164_v3  ;;  %v1173_v12 = vld [vmem:[%s1591_s1 + $0x58] sm:$0xff]   ;;  %v1177_v16 = vld [vmem:[%s1591_s1 + $0x60] sm:$0xff]   ;;  %v1181_v20 = vld [vmem:[%s1591_s1 + $0x68] sm:$0xff]  }
   0x6   :  { %1029 = vmatprep.subr.bf16.mxu1 %v1167_v6  ;;  %v1174_v13 = vld [vmem:[%s1591_s1 + $0x18] sm:$0xff]   ;;  %v1178_v17 = vld [vmem:[%s1591_s1 + $0x20] sm:$0xff]   ;;  %v1182_v21 = vld [vmem:[%s1591_s1 + $0x28] sm:$0xff]  }
   0x7   :  { %1008 = vmatpush3.bf16.msra.mxu0 %v1166_v5  ;;  %v1175_v14 = vld [vmem:[%s1591_s1 + $0xd8] sm:$0xff]   ;;  %v1179_v18 = vld [vmem:[%s1591_s1 + $0xe0] sm:$0xff]   ;;  %v1183_v22 = vld [vmem:[%s1591_s1 + $0xe8] sm:$0xff]  }
   0x8   :  { %1009 = vmatprep.subr.bf16.mxu0 %v1169_v8  ;;  %v1176_v15 = vld [vmem:[%s1591_s1 + $0x98] sm:$0xff]   ;;  %v1180_v19 = vld [vmem:[%s1591_s1 + $0xa0] sm:$0xff]   ;;  %v1184_v23 = vld [vmem:[%s1591_s1 + $0xa8] sm:$0xff]  }
   0x9   :  { %1030 = vmatpush3.bf16.msra.mxu1 %v1168_v7  ;;  %v1185_v24 = vld [vmem:[%s1591_s1 + $0x70] sm:$0xff]   ;;  %v1189_v28 = vld [vmem:[%s1591_s1 + $0x78] sm:$0xff]   ;;  %v28_v31 = vld [vmem:[%s1590_s0] sm:$0xff] }
   0xa   :  { %1031 = vmatprep.subr.bf16.mxu1 %v1171_v10  ;;  %v1186_v25 = vld [vmem:[%s1591_s1 + $0x30] sm:$0xff]   ;;  %v1190_v29 = vld [vmem:[%s1591_s1 + $0x38] sm:$0xff]   ;;  %v924_v32 = vcombine.low %v28_v31, %v28_v31  ;;  %v925_v33 = vcombine.high %v28_v31, %v28_v31  ;;  %v1195_v35 = vld [vmem:[%s1591_s1 + $0x140] sm:$0xff]  }
   0xb   :  { %1010 = vmatpush3.bf16.msra.mxu0 %v1170_v9  ;;  %v1187_v26 = vld [vmem:[%s1591_s1 + $0xf0] sm:$0xff]   ;;  %v1191_v30 = vld [vmem:[%s1591_s1 + $0xf8] sm:$0xff]   ;;  %v29_v36 = vld [vmem:[%s1590_s0 + $0x8] sm:$0xff] }
   0xc   :  { %1011 = vmatprep.subr.bf16.mxu0 %v1173_v12  ;;  %v1188_v27 = vld [vmem:[%s1591_s1 + $0xb0] sm:$0xff]   ;;  %v1194_v34 = vld [vmem:[%s1591_s1 + $0xb8] sm:$0xff]   ;;  %544 = vmatprep.mubr.bf16.mxu0 %v925_v33  ;;  %v926_v37 = vcombine.low %v29_v36, %v29_v36  ;;  %v927_v38 = vcombine.high %v29_v36, %v29_v36  ;;  %v1198_v39 = vld [vmem:[%s1591_s1 + $0x100] sm:$0xff]  }
   0xd   :  { %1032 = vmatpush3.bf16.msra.mxu1 %v1172_v11  ;;  %v1199_v40 = vld [vmem:[%s1591_s1 + $0x180] sm:$0xff]   ;;  %v1200_v41 = vld [vmem:[%s1591_s1 + $0x148] sm:$0xff]   ;;  %v1203_v45 = vld [vmem:[%s1591_s1 + $0x150] sm:$0xff]  }
   0xe   :  { %1033 = vmatprep.subr.bf16.mxu1 %v1175_v14  ;;  %584 = vmatprep.mubr.bf16.mxu1 %v927_v38  ;;  %v1201_v43 = vld [vmem:[%s1591_s1 + $0x108] sm:$0xff]   ;;  %v1204_v46 = vld [vmem:[%s1591_s1 + $0x110] sm:$0xff]   ;;  %v1206_v48 = vld [vmem:[%s1591_s1 + $0x158] sm:$0xff]  }
   0xf   :  { %1012 = vmatpush3.bf16.msra.mxu0 %v1174_v13  ;;  %v1202_v44 = vld [vmem:[%s1591_s1 + $0x188] sm:$0xff]   ;;  %v1205_v47 = vld [vmem:[%s1591_s1 + $0x190] sm:$0xff]   ;;  %v1207_v49 = vld [vmem:[%s1591_s1 + $0x118] sm:$0xff]  }
  0x10   :  { %1013 = vmatprep.subr.bf16.mxu0 %v1177_v16  ;;  %v1209_v50 = vld [vmem:[%s1591_s1 + $0x160] sm:$0xff]   ;;  %v1208_v51 = vld [vmem:[%s1591_s1 + $0x198] sm:$0xff]   ;;  %v1212_v53 = vld [vmem:[%s1591_s1 + $0x168] sm:$0xff]  }
  0x11   :  { %1034 = vmatpush3.bf16.msra.mxu1 %v1176_v15  ;;  %v1210_v52 = vld [vmem:[%s1591_s1 + $0x120] sm:$0xff]   ;;  %v1213_v55 = vld [vmem:[%s1591_s1 + $0x128] sm:$0xff]   ;;  %v1215_v56 = vld [vmem:[%s1591_s1 + $0x170] sm:$0xff]  }
  0x12   :  { %1035 = vmatprep.subr.bf16.mxu1 %v1179_v18  ;;  %v1211_v54 = vld [vmem:[%s1591_s1 + $0x1a0] sm:$0xff]   ;;  %v1214_v57 = vld [vmem:[%s1591_s1 + $0x1a8] sm:$0xff]   ;;  %v1216_v58 = vld [vmem:[%s1591_s1 + $0x130] sm:$0xff]  }
  0x13   :  { %1014 = vmatpush3.bf16.msra.mxu0 %v1178_v17  ;;  %v30_v59 = vld [vmem:[%s1590_s0 + $0x10] sm:$0xff]  ;;  %v1218_v62 = vld [vmem:[%s1591_s1 + $0x178] sm:$0xff]  }
  0x14   :  { %1015 = vmatprep.subr.bf16.mxu0 %v1181_v20  ;;  %v1217_v60 = vld [vmem:[%s1591_s1 + $0x1b0] sm:$0xff]   ;;  %v929_v61 = vcombine.high %v30_v59, %v30_v59  ;;  %v1219_v63 = vld [vmem:[%s1591_s1 + $0x138] sm:$0xff]   ;;  %v928_v1 = vcombine.low %v30_v59, %v30_v59 }
  0x15   :  { %1036 = vmatpush3.bf16.msra.mxu1 %v1180_v19  ;;  %v1222_v0 = vld [vmem:[%s1591_s1 + $0x1b8] sm:$0xff]  }
  0x16   :  { %1037 = vmatprep.subr.bf16.mxu1 %v1183_v22  ;;  %v1223_v2 = vld [vmem:[%s1590_s0 + $0x18] ss:$0 sps:$4 sm:$0xff]  }
  0x17   :  { %1016 = vmatpush3.bf16.msra.mxu0 %v1182_v21 }
  0x18   :  { %1017 = vmatprep.subr.bf16.mxu0 %v1185_v24 }
  0x19   :  { %1038 = vmatpush3.bf16.msra.mxu1 %v1184_v23 }
  0x1a   :  { %1039 = vmatprep.subr.bf16.mxu1 %v1187_v26 }
  0x1b   :  { %1018 = vmatpush3.bf16.msra.mxu0 %v1186_v25 }
  0x1c   :  { %1019 = vmatprep.subr.bf16.mxu0 %v1189_v28 }
  0x1d   :  { %1040 = vmatpush3.bf16.msra.mxu1 %v1188_v27 }
  0x1e   :  { %1041 = vmatprep.subr.bf16.mxu1 %v1191_v30 }
  0x1f   :  { %1020 = vmatpush3.bf16.msra.mxu0 %v1190_v29 }
  0x20   :  { %1049 = vmatprep.subr.bf16.mxu0 %v1195_v35 }
  0x21   :  { %1042 = vmatpush3.bf16.msra.mxu1 %v1194_v34 }
  0x22   :  { %545 = vmatmul.mubr.bf16.vlgmr.msra.gmra.mrb[0].mxu0 %v924_v32  ;;  %1098 = vmatprep.subr.bf16.mxu1 %v1268_v42 }
  0x23   :  { %1050 = vmatpush3.bf16.msra.mxu0 %v1198_v39  ;;  %624 = vmatprep.mubr.bf16.mxu0 %v929_v61 }
  0x24   :  { %585 = vmatmul.mubr.bf16.vlgmr.msra.gmra.mrb[0].mxu1 %v926_v37  ;;  %1051 = vmatprep.subr.bf16.mxu0 %v1200_v41 }
  0x25   :  { %1099 = vmatpush3.bf16.msra.mxu1 %v1199_v40  ;;  %1114 = vmatprep.mubr.msk.bf16.mxu1 %vm1269_vm0, %v1268_v42 }
  0x26   :  { %1100 = vmatprep.subr.bf16.mxu1 %v1268_v42 }
  0x27   :  { %1052 = vmatpush3.bf16.msra.mxu0 %v1201_v43 }
  0x28   :  { %1053 = vmatprep.subr.bf16.mxu0 %v1203_v45 }
  0x29   :  { %1101 = vmatpush3.bf16.msra.mxu1 %v1202_v44 }
  0x2a   :  { %1102 = vmatprep.subr.bf16.mxu1 %v1268_v42 }
  0x2b   :  { %1054 = vmatpush3.bf16.msra.mxu0 %v1204_v46 }
  0x2c   :  { %1055 = vmatprep.subr.bf16.mxu0 %v1206_v48 }
  0x2d   :  { %1103 = vmatpush3.bf16.msra.mxu1 %v1205_v47 }
  0x2e   :  { %1104 = vmatprep.subr.bf16.mxu1 %v1268_v42 }
  0x2f   :  { %1056 = vmatpush3.bf16.msra.mxu0 %v1207_v49 }
  0x30   :  { %1057 = vmatprep.subr.bf16.mxu0 %v1209_v50 }
  0x31   :  { %1105 = vmatpush3.bf16.msra.mxu1 %v1208_v51 }
  0x32   :  { %1106 = vmatprep.subr.bf16.mxu1 %v1268_v42 }
  0x33   :  { %1058 = vmatpush3.bf16.msra.mxu0 %v1210_v52 }
  0x34   :  { %1059 = vmatprep.subr.bf16.mxu0 %v1212_v53 }
  0x35   :  { %1107 = vmatpush3.bf16.msra.mxu1 %v1211_v54 }
  0x36   :  { %1108 = vmatprep.subr.bf16.mxu1 %v1268_v42 }
  0x37   :  { %1060 = vmatpush3.bf16.msra.mxu0 %v1213_v55 }
  0x38   :  { %1061 = vmatprep.subr.bf16.mxu0 %v1215_v56 }
  0x39   :  { %1109 = vmatpush3.bf16.msra.mxu1 %v1214_v57 }
  0x3a   :  { %1110 = vmatprep.subr.bf16.mxu1 %v1268_v42 }
  0x3b   :  { %1062 = vmatpush3.bf16.msra.mxu0 %v1216_v58 }
  0x3c   :  { %1063 = vmatprep.subr.bf16.mxu0 %v1218_v62 }
  0x3d   :  { %1111 = vmatpush3.bf16.msra.mxu1 %v1217_v60 }
  0x3e   :  { %1112 = vmatprep.subr.bf16.mxu1 %v1268_v42 }
  0x3f   :  { %1064 = vmatpush3.bf16.msra.mxu0 %v1219_v63 }
  0x40   :  { %1118 = vmatprep.subr.bf16.mxu0 %v1268_v42 }
  0x41   :  { %1113 = vmatpush3.bf16.msra.mxu1 %v1222_v0 }
  0x42   :  { %625 = vmatmul.mubr.bf16.vlgmr.msra.gmra.mrb[4].mxu0 %v928_v1  ;;  %1138 = vmatprep.subr.bf16.mxu1 %v1268_v42 }
  0x43   :  { %1134 = vmatprep.mubr.msk.bf16.mxu0 %vm1269_vm0, %v1268_v42 }
  0x44   :  { %12 = vsyncpa [#allocation3], 0  ;;  %1115 = vmatmul.mubr.bf16.vlgmr.msra.gmra.mrb[4].mxu1 %v1223_v2  ;;  %v1224_v3 = vld [vmem:[%s1593_s3] sm:$0xff]   ;;  %v1225_v4 = vld [vmem:[%s1593_s3 + $0x8] sm:$0xff]  }
  0x45   :  { %1154 = vmatprep.mubr.msk.bf16.mxu1 %vm1269_vm0, %v1268_v42  ;;  %1119 = vmatpush3.bf16.msra.mxu0 %v1224_v3  ;;  %v1226_v5 = vld [vmem:[%s1593_s3 + $0x10] sm:$0xff]   ;;  %v1227_v6 = vld [vmem:[%s1593_s3 + $0x18] sm:$0xff]   ;;  %v1228_v7 = vld [vmem:[%s1593_s3 + $0x20] sm:$0xff]  }
  0x46   :  { %1120 = vmatprep.subr.bf16.mxu0 %v1268_v42  ;;  %v1229_v8 = vld [vmem:[%s1593_s3 + $0x28] sm:$0xff]   ;;  %v1230_v9 = vld [vmem:[%s1593_s3 + $0x30] sm:$0xff]   ;;  %v1231_v10 = vld [vmem:[%s1593_s3 + $0x38] sm:$0xff]  }
  0x47   :  { %v1232_v11 = vld [vmem:[%s1595_s5] sm:$0xff]   ;;  %v1233_v12 = vld [vmem:[%s1595_s5 + $0x8] sm:$0xff]   ;;  %v1234_v13 = vld [vmem:[%s1595_s5 + $0x10] sm:$0xff]  }
  0x48   :  { %1139 = vmatpush3.bf16.msra.mxu1 %v1232_v11  ;;  %v1235_v14 = vld [vmem:[%s1595_s5 + $0x18] sm:$0xff]   ;;  %v1236_v15 = vld [vmem:[%s1595_s5 + $0x20] sm:$0xff]   ;;  %v1237_v16 = vld [vmem:[%s1595_s5 + $0x28] sm:$0xff]  }
  0x49   :  { %1121 = vmatpush3.bf16.msra.mxu0 %v1225_v4  ;;  %1140 = vmatprep.subr.bf16.mxu1 %v1268_v42  ;;  %v923_v18 = vld [vmem:[%s1592_s2] ss:$0 sm:$0xff]  ;;  %v1238_v44 = vld [vmem:[%s1595_s5 + $0x30] sm:$0xff]   ;;  %v1239_v45 = vld [vmem:[%s1595_s5 + $0x38] sm:$0xff]  }
  0x4a   :  { %1122 = vmatprep.subr.bf16.mxu0 %v1268_v42  ;;  %v987_v46 = vld [vmem:[%s1594_s4] ss:$0 sm:$0xff]  ;;  %s1270_s4 = smov [#allocation2]  }
  0x4b   :  { %s915_s5 = sshll.u32 %s1270_s4, 4  ;;  %s916_s5 = int_to_ptr.vmem [resolvable:$true] %s915_s5 }
  0x4c   :  { %1141 = vmatpush3.bf16.msra.mxu1 %v1233_v12  ;;  %p1249_p1 = scmp.lt.s32.totalorder %s916_s5, %s916_s5 }
  0x4d   :  { %1123 = vmatpush3.bf16.msra.mxu0 %v1226_v5  ;;  %1142 = vmatprep.subr.bf16.mxu1 %v1268_v42 }
  0x4e   :  { %1124 = vmatprep.subr.bf16.mxu0 %v1268_v42 }
  0x50   :  { %1143 = vmatpush3.bf16.msra.mxu1 %v1234_v13 }
  0x51   :  { %1125 = vmatpush3.bf16.msra.mxu0 %v1227_v6  ;;  %1144 = vmatprep.subr.bf16.mxu1 %v1268_v42 }
  0x52   :  { %1126 = vmatprep.subr.bf16.mxu0 %v1268_v42 }
  0x54   :  { %1145 = vmatpush3.bf16.msra.mxu1 %v1235_v14 }
  0x55   :  { %1127 = vmatpush3.bf16.msra.mxu0 %v1228_v7  ;;  %1146 = vmatprep.subr.bf16.mxu1 %v1268_v42 }
  0x56   :  { %1128 = vmatprep.subr.bf16.mxu0 %v1268_v42 }
  0x58   :  { %1147 = vmatpush3.bf16.msra.mxu1 %v1236_v15 }
  0x59   :  { %1129 = vmatpush3.bf16.msra.mxu0 %v1229_v8  ;;  %1148 = vmatprep.subr.bf16.mxu1 %v1268_v42 }
  0x5a   :  { %1130 = vmatprep.subr.bf16.mxu0 %v1268_v42 }
  0x5c   :  { %1149 = vmatpush3.bf16.msra.mxu1 %v1237_v16 }
  0x5d   :  { %1131 = vmatpush3.bf16.msra.mxu0 %v1230_v9  ;;  %1150 = vmatprep.subr.bf16.mxu1 %v1268_v42 }
  0x5e   :  { %1132 = vmatprep.subr.bf16.mxu0 %v1268_v42 }
  0x60   :  { %1151 = vmatpush3.bf16.msra.mxu1 %v1238_v44 }
  0x61   :  { %1133 = vmatpush3.bf16.msra.mxu0 %v1231_v10  ;;  %1152 = vmatprep.subr.bf16.mxu1 %v1268_v42  ;;  %v996_v42 = vld [vmem:[%s1596_s6] ss:$0 sm:$0xff]  ;;  %s1244_s6 = scalar_lea.vmem %s916_s5, 128 }
  0x62   :  { %p1245_p0 = scmp.ne.s32.totalorder %s916_s5, %s1244_s6  ;;  %p1250_p2 = scmp.lt.s32.totalorder %s1244_s6, %s1244_s6 }
  0x64   :  { %1153 = vmatpush3.bf16.msra.mxu1 %v1239_v45  ;;  %p1251_p3 = por %p1250_p2, %p1249_p1 }
  0x66   :  { %p1252_p4 = pnand %p1251_p3, %p1245_p0 }
  0xf5   :  { %v1021_v17 = vpop.f32.mrb[0].mxu0 }
  0xf6   :  { %v1022_v19 = vpop.f32.mrb[1].mxu0 }
  0xf7   :  { %v1023_v20 = vadd.f32 %v1022_v19, %v1021_v17  ;;  %v1024_v21 = vpop.f32.mrb[2].mxu0  ;;  %v1043_v22 = vpop.f32.mrb[0].mxu1 }
  0xf8   :  { %v1025_v23 = vpop.f32.mrb[3].mxu0  ;;  %v1044_v24 = vpop.f32.mrb[1].mxu1 }
  0xf9   :  { %v547_v25 = vadd.f32 %v1023_v20, %v923_v18  ;;  %v1045_v26 = vadd.f32 %v1044_v24, %v1043_v22  ;;  %v1046_v27 = vpop.f32.mrb[2].mxu1 }
  0xfa   :  { %v1047_v28 = vpop.f32.mrb[3].mxu1 }
  0xfb   :  { %v587_v29 = vadd.f32 %v1045_v26, %v547_v25 }
 0x115   :  { %v1065_v30 = vpop.f32.mrb[4].mxu0 }
 0x116   :  { %v1066_v31 = vpop.f32.mrb[5].mxu0 }
 0x117   :  { %v1067_v32 = vadd.f32 %v1066_v31, %v1065_v30  ;;  %v1068_v33 = vpop.f32.mrb[6].mxu0  ;;  %v666_v34 = vpop.f32.mrb[4].mxu1 }
 0x118   :  { %v1069_v35 = vpop.f32.mrb[7].mxu0  ;;  %v1116_v36 = vpop.f32.mrb[5].mxu1 }
 0x119   :  { %v627_v37 = vadd.f32 %v1067_v32, %v587_v29  ;;  %v669_v38 = vpop.f32.mrb[6].mxu1 }
 0x11a   :  { %v1117_v39 = vpop.f32.mrb[7].mxu1 }
 0x11b   :  { %v667_v40 = vadd.f32 %v666_v34, %v627_v37 }
 0x11d   :  { %v672_v41 = vmax.f32 %v667_v40, 0.0 }
 0x11f   :  { %v673_v43 = vpack.c.bf16 %v672_v41, %v672_v41 }
 0x121   :  { %1135 = vmatmul.mubr.bf16.vlgmr.msra.gmra.mrb[8].mxu0 %v673_v43 }
 0x1f4   :  { %v779_v47 = vpop.f32.mrb[8].mxu0 }
 0x1f5   :  { %v780_v48 = vadd.f32 %v987_v46, %v779_v47  ;;  %v1136_v49 = vpop.f32.mrb[9].mxu0 }
 0x1f6   :  { %v782_v50 = vpop.f32.mrb[10].mxu0 }
 0x1f7   :  { %v785_v51 = vmax.f32 %v780_v48, 0.0  ;;  %v1137_v52 = vpop.f32.mrb[11].mxu0 }
 0x1f9   :  { %v786_v53 = vpack.c.bf16 %v785_v51, %v785_v51 }
 0x1fb   :  { %1155 = vmatmul.mubr.bf16.vlgmr.msra.gmra.mrb[8].mxu1 %v786_v53 }
 0x2ce   :  { %v892_v54 = vpop.f32.mrb[8].mxu1 }
 0x2cf   :  { %v893_v55 = vadd.f32 %v996_v42, %v892_v54  ;;  %v1156_v56 = vpop.f32.mrb[9].mxu1 }
 0x2d0   :  { %v895_v57 = vpop.f32.mrb[10].mxu1 }
 0x2d1   :  { %898 = vmax.xlane.f32.xlu0 %v893_v55  ;;  %v1157_v58 = vpop.f32.mrb[11].mxu1 }
 0x35e   :  { %v899_v59 = vpop.xlane.xlu0 %898 }
 0x35f   :  { %v900_v60 = vsub.f32 %v893_v55, %v899_v59 }
 0x361   :  { %v901_v61 = vmul.f32 1.442695, %v900_v60 }
 0x363   :  { %1240 = vpow2.f32 %v901_v61 }
 0x36d   :  { %v1241_v62 = vpop.eup %1240 }
 0x36e   :  { %903 = vadd.xlane.f32.xlu0 %v1241_v62 }
 0x3fb   :  { %v904_v63 = vpop.xlane.xlu0 %903 }
 0x3fc   :  { %1242 = vlog2.f32 %v904_v63 }
 0x406   :  { %v1243_v0 = vpop.eup %1242 }
 0x407   :  { %v906_v1 = vmul.f32 0.6931472, %v1243_v0 }
 0x409   :  { %v907_v2 = vsub.f32 %v900_v60, %v906_v1 }
 0x40b   :  { %908 = vst [vmem:[#allocation2] sm:$0xff] %v907_v2 }
 0x40c   :  { %1255 = shalt.err (!%p1252_p4)
}
 0x40d   :  { %s1256_s17 = scalar_lea.hbm %s1597_s7, 128 }
 0x40e   :  { %p1257_p5 = scmp.ne.s32.totalorder %s1597_s7, %s1256_s17  ;;  %p1260_p6 = scmp.lt.u32.totalorder %s1256_s17, %s1597_s7 }
 0x410   :  { %p1262_p7 = pnand %p1260_p6, %p1257_p5 }
 0x412   :  { %1265 = shalt.err (!%p1262_p7)
}
 0x413   :  { %918 = dma.vmem_to_hbm [thread:$0]  %s916_s5, 128, %s1597_s7, [#allocation3]  }
 0x414   :  { %1266 = dma.done.wait [#allocation3], 128  }
 0x415   :  { %1267 = vsyncadd [#allocation3], 4294967168 }
 0x416   :  { %922 = vsyncpa [#allocation3], 1 }

</bundles_post_ra>
